<compile_context>
chip_gen: v5e
topology: v5e:2x2
jax: 0.10.0
libtpu: 0.0.40
codegen_flags: <defaults>
</compile_context>

<pallas_src>
import jax
import jax.numpy as jnp
from jax import lax
from jax.experimental import pallas as pl
from jax.experimental.pallas import tpu as pltpu

_NEG_BIG = -1e30  # finite "-inf" used to mask padded lanes


def _round_up(x, m):
    return ((x + m - 1) // m) * m


def _attn_decoder_kernel(tok_ref,                      # (T,) int32, scalar-prefetched (SMEM)
                         emb_ref, h0_ref, c0_ref,      # (Vocab,H), (1,H), (1,H)
                         wxh_ref, b_ref,               # (2H,4H), (1,4H)
                         enc_ref, sbias_ref,           # (Lp,H), (1,Lp)
                         wout_ref, bout_ref,           # (2H,Vp), (1,Vp)
                         logp_ref, attn_ref,           # (T,Vp), (T,Lp)
                         h_out_ref, c_out_ref):        # (1,H), (1,H)
    T = logp_ref.shape[0]
    H = h0_ref.shape[-1]

    # Load weights / encoder context once; they stay resident for all T steps.
    wxh = wxh_ref[...]
    bias = b_ref[...]
    enc = enc_ref[...]
    sbias = sbias_ref[...]
    wout = wout_ref[...]
    bout = bout_ref[...]

    def step(t, carry):
        h, c = carry                                              # each (1, H)

        # output = relu(embedding(input)): in-kernel row gather from resident table.
        tok = tok_ref[t]
        x = jnp.maximum(emb_ref[pl.ds(tok, 1), :], 0.0)           # (1, H)

        # Single fused LSTM gate matmul: [x, h] @ [W_ih; W_hh] -> (1, 4H).
        xh = jnp.concatenate([x, h], axis=-1)                     # (1, 2H)
        gates = jnp.dot(xh, wxh, preferred_element_type=jnp.float32) + bias
        sig = jax.nn.sigmoid(gates)                               # one full-row pass
        tnh = jnp.tanh(gates)                                     # one full-row pass
        i_g = sig[:, 0 * H:1 * H]
        f_g = sig[:, 1 * H:2 * H]
        g_g = tnh[:, 2 * H:3 * H]
        o_g = sig[:, 3 * H:4 * H]
        c_new = f_g * c + i_g * g_g
        h_new = o_g * jnp.tanh(c_new)

        # attn = softmax(h_new @ enc^T); padded L lanes are masked via sbias.
        scores = lax.dot_general(h_new, enc, (((1,), (1,)), ((), ())),
                                 preferred_element_type=jnp.float32) + sbias
        scores = scores - jnp.max(scores, axis=-1, keepdims=True)
        e = jnp.exp(scores)
        attn = e / jnp.sum(e, axis=-1, keepdims=True)             # exact reciprocal

        # context = attn @ enc ; logits = [h_new, context] @ W_out + b_out.
        context = jnp.dot(attn, enc, preferred_element_type=jnp.float32)   # (1, H)
        hc = jnp.concatenate([h_new, context], axis=-1)                    # (1, 2H)
        logits = jnp.dot(hc, wout, preferred_element_type=jnp.float32) + bout
        m = jnp.max(logits, axis=-1, keepdims=True)
        s = logits - m
        lse = jnp.log(jnp.sum(jnp.exp(s), axis=-1, keepdims=True))

        # Lane-dense per-step stores into the (T, 128k) output slabs.
        logp_ref[pl.ds(t, 1), :] = s - lse
        attn_ref[pl.ds(t, 1), :] = attn
        return (h_new, c_new)

    h_f, c_f = lax.fori_loop(0, T, step, (h0_ref[...], c0_ref[...]))
    # Only the final state is emitted (that is all the caller consumes).
    h_out_ref[...] = h_f
    c_out_ref[...] = c_f


def prepare_params(params):
    """One-time weight re-layout (hoisted off the per-step path)."""
    H = params["w_hh"].shape[0]
    V = params["w_out"].shape[1]
    Vp = _round_up(V, 128)
    emb = params["embedding"].astype(jnp.float32)                         # (Vocab, H)
    # Fused gate weights: [W_ih; W_hh] -> (2H, 4H); combined bias (1, 4H).
    wxh = jnp.concatenate([params["w_ih"], params["w_hh"]], axis=0).astype(jnp.float32)
    b = (params["b_ih"] + params["b_hh"]).reshape(1, 4 * H).astype(jnp.float32)
    # Output projection padded to a lane-dense width; padded bias lanes = -1e30
    # so log_softmax over the real V columns is unchanged.
    wout = jnp.pad(params["w_out"].astype(jnp.float32), ((0, 0), (0, Vp - V)))
    bout = jnp.pad(params["b_out"].astype(jnp.float32).reshape(1, V),
                   ((0, 0), (0, Vp - V)), constant_values=_NEG_BIG)
    return {"emb": emb, "wxh": wxh, "b": b, "wout": wout, "bout": bout,
            "H": H, "V": V, "Vp": Vp}


def attn_decoder_decode(tokens, hidden, encoder_outputs, prep):
    """T teacher-forced AttnDecoder.forward steps fused into ONE pallas_call.

    Returns (log_probs[T, V], (h, c) final each (1,1,H), attn_weights[T, L]).
    """
    h0, c0 = hidden
    H, V, Vp = prep["H"], prep["V"], prep["Vp"]
    L = encoder_outputs.shape[0]
    Lp = _round_up(max(L, 1), 128)
    T = tokens.shape[0]
    Vocab = prep["emb"].shape[0]

    tokens = tokens.astype(jnp.int32)
    h0 = h0.reshape(1, H).astype(jnp.float32)
    c0 = c0.reshape(1, H).astype(jnp.float32)
    enc = encoder_outputs.astype(jnp.float32)
    enc_pad = jnp.pad(enc, ((0, Lp - L), (0, 0)))                          # zero rows
    score_bias = jnp.where(jnp.arange(Lp) < L, 0.0, _NEG_BIG)
    score_bias = score_bias.astype(jnp.float32).reshape(1, Lp)

    grid_spec = pltpu.PrefetchScalarGridSpec(
        num_scalar_prefetch=1,                 # token ids -> SMEM
        grid=(1,),                             # whole decode loop runs in-kernel
        in_specs=[
            pl.BlockSpec((Vocab, H), lambda i, tok: (0, 0)),   # embedding table
            pl.BlockSpec((1, H), lambda i, tok: (0, 0)),       # h0
            pl.BlockSpec((1, H), lambda i, tok: (0, 0)),       # c0
            pl.BlockSpec((2 * H, 4 * H), lambda i, tok: (0, 0)),  # fused gate weights
            pl.BlockSpec((1, 4 * H), lambda i, tok: (0, 0)),   # combined bias
            pl.BlockSpec((Lp, H), lambda i, tok: (0, 0)),      # encoder outputs (padded)
            pl.BlockSpec((1, Lp), lambda i, tok: (0, 0)),      # score mask bias
            pl.BlockSpec((2 * H, Vp), lambda i, tok: (0, 0)),  # output projection (padded)
            pl.BlockSpec((1, Vp), lambda i, tok: (0, 0)),      # output bias (padded)
        ],
        out_specs=[
            pl.BlockSpec((T, Vp), lambda i, tok: (0, 0)),      # log-probs slab
            pl.BlockSpec((T, Lp), lambda i, tok: (0, 0)),      # attn weights slab
            pl.BlockSpec((1, H), lambda i, tok: (0, 0)),       # final h
            pl.BlockSpec((1, H), lambda i, tok: (0, 0)),       # final c
        ],
    )
    out_shape = (
        jax.ShapeDtypeStruct((T, Vp), jnp.float32),
        jax.ShapeDtypeStruct((T, Lp), jnp.float32),
        jax.ShapeDtypeStruct((1, H), jnp.float32),
        jax.ShapeDtypeStruct((1, H), jnp.float32),
    )
    logp_p, attn_p, h_f, c_f = pl.pallas_call(
        _attn_decoder_kernel,
        grid_spec=grid_spec,
        out_shape=out_shape,
        compiler_params=pltpu.CompilerParams(
            dimension_semantics=("arbitrary",)),
    )(tokens, prep["emb"], h0, c0, prep["wxh"], prep["b"],
      enc_pad, score_bias, prep["wout"], prep["bout"])

    logp = logp_p[:, :V]
    attn = attn_p[:, :L]
    return logp, (h_f.reshape(1, 1, H), c_f.reshape(1, 1, H)), attn


def attn_decoder_step(token, hidden, encoder_outputs, prep):
    """Single AttnDecoder.forward step (T=1 instance of the fused kernel)."""
    tokens = jnp.asarray(token, jnp.int32).reshape(1)
    logp, hc, attn = attn_decoder_decode(tokens, hidden, encoder_outputs, prep)
    return logp, hc, attn


def init_params(key, hidden_size, output_size):
    """Deterministic synthetic parameters (shapes match the PyTorch module)."""
    ks = jax.random.split(key, 7)
    s = 0.1
    return {
        # nn.Embedding(output_size, hidden_size) weight (== embedding_matrix)
        "embedding": s * jax.random.normal(ks[0], (output_size, hidden_size), jnp.float32),
        # nn.LSTM weights, stored transposed so the kernel does x @ W (gate order i,f,g,o)
        "w_ih": s * jax.random.normal(ks[1], (hidden_size, 4 * hidden_size), jnp.float32),
        "w_hh": s * jax.random.normal(ks[2], (hidden_size, 4 * hidden_size), jnp.float32),
        "b_ih": s * jax.random.normal(ks[3], (4 * hidden_size,), jnp.float32),
        "b_hh": s * jax.random.normal(ks[4], (4 * hidden_size,), jnp.float32),
        # nn.Linear(2*hidden, output_size), stored transposed
        "w_out": s * jax.random.normal(ks[5], (2 * hidden_size, output_size), jnp.float32),
        "b_out": s * jax.random.normal(ks[6], (output_size,), jnp.float32),
    }


def reference_step(token, hidden, encoder_outputs, params):
    """Pure-JAX replica of the PyTorch forward (for correctness checking)."""
    h0, c0 = hidden
    H = params["w_hh"].shape[0]
    x = jnp.maximum(params["embedding"][token].reshape(1, H), 0.0)
    h = h0.reshape(1, H)
    c = c0.reshape(1, H)
    gates = x @ params["w_ih"] + h @ params["w_hh"] + params["b_ih"] + params["b_hh"]
    i_g = jax.nn.sigmoid(gates[:, 0 * H:1 * H])
    f_g = jax.nn.sigmoid(gates[:, 1 * H:2 * H])
    g_g = jnp.tanh(gates[:, 2 * H:3 * H])
    o_g = jax.nn.sigmoid(gates[:, 3 * H:4 * H])
    c_new = f_g * c + i_g * g_g
    h_new = o_g * jnp.tanh(c_new)
    attn = jax.nn.softmax(h_new @ encoder_outputs.T, axis=-1)
    context = attn @ encoder_outputs
    logits = jnp.concatenate([h_new, context], -1) @ params["w_out"] + params["b_out"]
    logp = jax.nn.log_softmax(logits, axis=-1)
    return logp, (h_new.reshape(1, 1, H), c_new.reshape(1, 1, H)), attn


if __name__ == "__main__":
    HIDDEN = 32      # hidden_size
    VOCAB = 64       # output_size
    MAX_LENGTH = 8   # encoder sequence length
    T = 6            # fused teacher-forced decode steps

    root = jax.random.PRNGKey(0)
    k_params, k_h, k_c, k_enc = jax.random.split(root, 4)

    params = init_params(k_params, HIDDEN, VOCAB)
    prep = prepare_params(params)

    tokens = jnp.array([3, 17, 5, 42, 0, 63], dtype=jnp.int32)          # decoder inputs
    hidden = (jax.random.normal(k_h, (1, 1, HIDDEN), jnp.float32),      # h0
              jax.random.normal(k_c, (1, 1, HIDDEN), jnp.float32))      # c0
    encoder_outputs = jax.random.normal(k_enc, (MAX_LENGTH, HIDDEN), jnp.float32)

    logp, (h_new, c_new), attn = attn_decoder_decode(tokens, hidden, encoder_outputs, prep)
    jax.block_until_ready((logp, h_new, c_new, attn))

    # Reference: call the pure-JAX per-step replica T times.
    hid = hidden
    logp_rows, attn_rows = [], []
    for t in range(T):
        lp, hid, aw = reference_step(tokens[t], hid, encoder_outputs, params)
        logp_rows.append(lp)
        attn_rows.append(aw)
    logp_r = jnp.concatenate(logp_rows, axis=0)
    attn_r = jnp.concatenate(attn_rows, axis=0)
    h_r, c_r = hid

    # Approx reciprocal removed (exact softmax divide). Remaining tolerance covers
    # MXU default-precision f32 matmul rounding vs. the XLA reference path.
    assert jnp.allclose(logp, logp_r, atol=2e-3), "log-probs mismatch"
    assert jnp.allclose(attn, attn_r, atol=2e-3), "attn mismatch"
    assert jnp.allclose(h_new, h_r, atol=2e-3), "h mismatch"
    assert jnp.allclose(c_new, c_r, atol=2e-3), "c mismatch"

    print("KERNEL_OK")
</pallas_src>

<mosaic_0001>
module attributes {stable_mosaic.version = 11 : i64} {
  func.func @_attn_decoder_kernel(%arg0: i32, %arg1: memref<6xi32, #tpu.memory_space<smem>>, %arg2: memref<64x32xf32, #tpu.memory_space<vmem>>, %arg3: memref<1x32xf32, #tpu.memory_space<vmem>>, %arg4: memref<1x32xf32, #tpu.memory_space<vmem>>, %arg5: memref<64x128xf32, #tpu.memory_space<vmem>>, %arg6: memref<1x128xf32, #tpu.memory_space<vmem>>, %arg7: memref<128x32xf32, #tpu.memory_space<vmem>>, %arg8: memref<1x128xf32, #tpu.memory_space<vmem>>, %arg9: memref<64x128xf32, #tpu.memory_space<vmem>>, %arg10: memref<1x128xf32, #tpu.memory_space<vmem>>, %arg11: memref<6x128xf32, #tpu.memory_space<vmem>>, %arg12: memref<6x128xf32, #tpu.memory_space<vmem>>, %arg13: memref<1x32xf32, #tpu.memory_space<vmem>>, %arg14: memref<1x32xf32, #tpu.memory_space<vmem>>) attributes {dimension_semantics = [#tpu.dimension_semantics<arbitrary>], iteration_bounds = array<i64: 1>, scalar_prefetch = 1 : i64, scratch_operands = 0 : i64, tpu.core_type = #tpu.core_type<tc>, window_params = [{pipeline_mode = #tpu.pipeline_mode<synchronous>, transform_indices = @transform_0, window_bounds = array<i64: 64, 32>}, {pipeline_mode = #tpu.pipeline_mode<synchronous>, transform_indices = @transform_1, window_bounds = array<i64: 1, 32>}, {pipeline_mode = #tpu.pipeline_mode<synchronous>, transform_indices = @transform_2, window_bounds = array<i64: 1, 32>}, {pipeline_mode = #tpu.pipeline_mode<synchronous>, transform_indices = @transform_3, window_bounds = array<i64: 64, 128>}, {pipeline_mode = #tpu.pipeline_mode<synchronous>, transform_indices = @transform_4, window_bounds = array<i64: 1, 128>}, {pipeline_mode = #tpu.pipeline_mode<synchronous>, transform_indices = @transform_5, window_bounds = array<i64: 128, 32>}, {pipeline_mode = #tpu.pipeline_mode<synchronous>, transform_indices = @transform_6, window_bounds = array<i64: 1, 128>}, {pipeline_mode = #tpu.pipeline_mode<synchronous>, transform_indices = @transform_7, window_bounds = array<i64: 64, 128>}, {pipeline_mode = #tpu.pipeline_mode<synchronous>, transform_indices = @transform_8, window_bounds = array<i64: 1, 128>}, {pipeline_mode = #tpu.pipeline_mode<synchronous>, transform_indices = @transform_9, window_bounds = array<i64: 6, 128>}, {pipeline_mode = #tpu.pipeline_mode<synchronous>, transform_indices = @transform_10, window_bounds = array<i64: 6, 128>}, {pipeline_mode = #tpu.pipeline_mode<synchronous>, transform_indices = @transform_11, window_bounds = array<i64: 1, 32>}, {pipeline_mode = #tpu.pipeline_mode<synchronous>, transform_indices = @transform_12, window_bounds = array<i64: 1, 32>}]} {
    %c0 = arith.constant 0 : index
    %c0_0 = arith.constant 0 : index
    %0 = vector.load %arg5[%c0, %c0_0] : memref<64x128xf32, #tpu.memory_space<vmem>>, vector<64x128xf32>
    %c0_1 = arith.constant 0 : index
    %c0_2 = arith.constant 0 : index
    %1 = vector.load %arg6[%c0_1, %c0_2] : memref<1x128xf32, #tpu.memory_space<vmem>>, vector<1x128xf32>
    %c0_3 = arith.constant 0 : index
    %c0_4 = arith.constant 0 : index
    %2 = vector.load %arg7[%c0_3, %c0_4] : memref<128x32xf32, #tpu.memory_space<vmem>>, vector<128x32xf32>
    %c0_5 = arith.constant 0 : index
    %c0_6 = arith.constant 0 : index
    %3 = vector.load %arg8[%c0_5, %c0_6] : memref<1x128xf32, #tpu.memory_space<vmem>>, vector<1x128xf32>
    %c0_7 = arith.constant 0 : index
    %c0_8 = arith.constant 0 : index
    %4 = vector.load %arg9[%c0_7, %c0_8] : memref<64x128xf32, #tpu.memory_space<vmem>>, vector<64x128xf32>
    %c0_9 = arith.constant 0 : index
    %c0_10 = arith.constant 0 : index
    %5 = vector.load %arg10[%c0_9, %c0_10] : memref<1x128xf32, #tpu.memory_space<vmem>>, vector<1x128xf32>
    %c0_11 = arith.constant 0 : index
    %c0_12 = arith.constant 0 : index
    %6 = vector.load %arg3[%c0_11, %c0_12] : memref<1x32xf32, #tpu.memory_space<vmem>>, vector<1x32xf32>
    %c0_13 = arith.constant 0 : index
    %c0_14 = arith.constant 0 : index
    %7 = vector.load %arg4[%c0_13, %c0_14] : memref<1x32xf32, #tpu.memory_space<vmem>>, vector<1x32xf32>
    %c0_i32 = arith.constant 0 : i32
    %c6_i32 = arith.constant 6 : i32
    %8 = arith.addi %c0_i32, %c6_i32 : i32
    %c1_i32 = arith.constant 1 : i32
    %9:2 = scf.for %arg15 = %c0_i32 to %8 step %c1_i32 iter_args(%arg16 = %6, %arg17 = %7) -> (vector<1x32xf32>, vector<1x32xf32>)  : i32 {
      %12 = arith.index_cast %arg15 : i32 to index
      %13 = memref.load %arg1[%12] : memref<6xi32, #tpu.memory_space<smem>>
      %14 = arith.index_cast %13 : i32 to index
      %c0_20 = arith.constant 0 : index
      %15 = vector.load %arg2[%14, %c0_20] : memref<64x32xf32, #tpu.memory_space<vmem>>, vector<1x32xf32>
      %cst = arith.constant 0.000000e+00 : f32
      %16 = vector.broadcast %cst : f32 to vector<1x32xf32>
      %17 = arith.maximumf %15, %16 : vector<1x32xf32>
      %18 = tpu.concatenate %17, %arg16 in 1 : vector<1x32xf32>, vector<1x32xf32> -> vector<1x64xf32>
      %cst_21 = arith.constant dense<0.000000e+00> : vector<1x128xf32>
      %19 = tpu.matmul %18, %0, %cst_21 {dimension_numbers = #tpu.dot_dimension_numbers<[1], [0], [0], [1], [0, 0, 1, 1], [], []>} : vector<1x64xf32>, vector<64x128xf32>, vector<1x128xf32> -> vector<1x128xf32>
      %20 = arith.addf %19, %1 : vector<1x128xf32>
      %21 = arith.negf %20 : vector<1x128xf32>
      %22 = math.exp %21 : vector<1x128xf32>
      %cst_22 = arith.constant 1.000000e+00 : f32
      %23 = vector.broadcast %cst_22 : f32 to vector<1x128xf32>
      %24 = arith.addf %23, %22 : vector<1x128xf32>
      %25 = arith.divf %23, %24 : vector<1x128xf32>
      %26 = math.tanh %20 : vector<1x128xf32>
      %27 = vector.extract_strided_slice %25 {offsets = [0, 0], sizes = [1, 32], strides = [1, 1]} : vector<1x128xf32> to vector<1x32xf32>
      %28 = vector.extract_strided_slice %25 {offsets = [0, 32], sizes = [1, 32], strides = [1, 1]} : vector<1x128xf32> to vector<1x32xf32>
      %29 = vector.extract_strided_slice %26 {offsets = [0, 64], sizes = [1, 32], strides = [1, 1]} : vector<1x128xf32> to vector<1x32xf32>
      %30 = vector.extract_strided_slice %25 {offsets = [0, 96], sizes = [1, 32], strides = [1, 1]} : vector<1x128xf32> to vector<1x32xf32>
      %31 = arith.mulf %28, %arg17 : vector<1x32xf32>
      %32 = arith.mulf %27, %29 : vector<1x32xf32>
      %33 = arith.addf %31, %32 : vector<1x32xf32>
      %34 = math.tanh %33 : vector<1x32xf32>
      %35 = arith.mulf %30, %34 : vector<1x32xf32>
      %cst_23 = arith.constant dense<0.000000e+00> : vector<1x128xf32>
      %36 = tpu.matmul %35, %2, %cst_23 {dimension_numbers = #tpu.dot_dimension_numbers<[1], [1], [0], [0], [0, 0, 1, 0], [], []>} : vector<1x32xf32>, vector<128x32xf32>, vector<1x128xf32> -> vector<1x128xf32>
      %37 = arith.addf %36, %3 : vector<1x128xf32>
      %cst_24 = arith.constant dense<0xFF800000> : vector<1xf32>
      %38 = vector.multi_reduction <maximumf>, %37, %cst_24 [1] : vector<1x128xf32> to vector<1xf32>
      %39 = vector.shape_cast %38 : vector<1xf32> to vector<1x1xf32>
      %40 = vector.broadcast %39 : vector<1x1xf32> to vector<1x128xf32>
      %41 = arith.subf %37, %40 : vector<1x128xf32>
      %42 = math.exp %41 : vector<1x128xf32>
      %cst_25 = arith.constant dense<0.000000e+00> : vector<1xf32>
      %43 = vector.multi_reduction <add>, %42, %cst_25 [1] : vector<1x128xf32> to vector<1xf32>
      %44 = vector.shape_cast %43 : vector<1xf32> to vector<1x1xf32>
      %45 = vector.broadcast %44 : vector<1x1xf32> to vector<1x128xf32>
      %46 = arith.divf %42, %45 : vector<1x128xf32>
      %cst_26 = arith.constant dense<0.000000e+00> : vector<1x32xf32>
      %47 = tpu.matmul %46, %2, %cst_26 {dimension_numbers = #tpu.dot_dimension_numbers<[1], [0], [0], [1], [0, 0, 1, 1], [], []>} : vector<1x128xf32>, vector<128x32xf32>, vector<1x32xf32> -> vector<1x32xf32>
      %48 = tpu.concatenate %35, %47 in 1 : vector<1x32xf32>, vector<1x32xf32> -> vector<1x64xf32>
      %cst_27 = arith.constant dense<0.000000e+00> : vector<1x128xf32>
      %49 = tpu.matmul %48, %4, %cst_27 {dimension_numbers = #tpu.dot_dimension_numbers<[1], [0], [0], [1], [0, 0, 1, 1], [], []>} : vector<1x64xf32>, vector<64x128xf32>, vector<1x128xf32> -> vector<1x128xf32>
      %50 = arith.addf %49, %5 : vector<1x128xf32>
      %cst_28 = arith.constant dense<0xFF800000> : vector<1xf32>
      %51 = vector.multi_reduction <maximumf>, %50, %cst_28 [1] : vector<1x128xf32> to vector<1xf32>
      %52 = vector.shape_cast %51 : vector<1xf32> to vector<1x1xf32>
      %53 = vector.broadcast %52 : vector<1x1xf32> to vector<1x128xf32>
      %54 = arith.subf %50, %53 : vector<1x128xf32>
      %55 = math.exp %54 : vector<1x128xf32>
      %cst_29 = arith.constant dense<0.000000e+00> : vector<1xf32>
      %56 = vector.multi_reduction <add>, %55, %cst_29 [1] : vector<1x128xf32> to vector<1xf32>
      %57 = vector.shape_cast %56 : vector<1xf32> to vector<1x1xf32>
      %58 = math.log %57 : vector<1x1xf32>
      %59 = vector.broadcast %58 : vector<1x1xf32> to vector<1x128xf32>
      %60 = arith.subf %54, %59 : vector<1x128xf32>
      %61 = arith.index_cast %arg15 : i32 to index
      %c0_30 = arith.constant 0 : index
      %62 = vector.load %arg11[%61, %c0_30] : memref<6x128xf32, #tpu.memory_space<vmem>>, vector<1x128xf32>
      tpu.vector_store %arg11[%61, %c0_30], %60 {strides = array<i32>} : memref<6x128xf32, #tpu.memory_space<vmem>>, vector<1x128xf32>,
      %63 = arith.index_cast %arg15 : i32 to index
      %c0_31 = arith.constant 0 : index
      %64 = vector.load %arg12[%63, %c0_31] : memref<6x128xf32, #tpu.memory_space<vmem>>, vector<1x128xf32>
      tpu.vector_store %arg12[%63, %c0_31], %46 {strides = array<i32>} : memref<6x128xf32, #tpu.memory_space<vmem>>, vector<1x128xf32>,
      scf.yield %35, %33 : vector<1x32xf32>, vector<1x32xf32>
    }
    %c6_i32_15 = arith.constant 6 : i32
    %c0_16 = arith.constant 0 : index
    %c0_17 = arith.constant 0 : index
    %10 = vector.load %arg13[%c0_16, %c0_17] : memref<1x32xf32, #tpu.memory_space<vmem>>, vector<1x32xf32>
    tpu.vector_store %arg13[%c0_16, %c0_17], %9#0 {strides = array<i32>} : memref<1x32xf32, #tpu.memory_space<vmem>>, vector<1x32xf32>,
    %c0_18 = arith.constant 0 : index
    %c0_19 = arith.constant 0 : index
    %11 = vector.load %arg14[%c0_18, %c0_19] : memref<1x32xf32, #tpu.memory_space<vmem>>, vector<1x32xf32>
    tpu.vector_store %arg14[%c0_18, %c0_19], %9#1 {strides = array<i32>} : memref<1x32xf32, #tpu.memory_space<vmem>>, vector<1x32xf32>,
    return
  }
  func.func @transform_0(%arg0: i32, %arg1: memref<6xi32, #tpu.memory_space<smem>>) -> (i32, i32) {
    %c0_i32 = arith.constant 0 : i32
    %c0_i32_0 = arith.constant 0 : i32
    %c0_i32_1 = arith.constant 0 : i32
    return %c0_i32, %c0_i32_0 : i32, i32
  }
  func.func @transform_1(%arg0: i32, %arg1: memref<6xi32, #tpu.memory_space<smem>>) -> (i32, i32) {
    %c0_i32 = arith.constant 0 : i32
    %c0_i32_0 = arith.constant 0 : i32
    %c0_i32_1 = arith.constant 0 : i32
    return %c0_i32, %c0_i32_0 : i32, i32
  }
  func.func @transform_2(%arg0: i32, %arg1: memref<6xi32, #tpu.memory_space<smem>>) -> (i32, i32) {
    %c0_i32 = arith.constant 0 : i32
    %c0_i32_0 = arith.constant 0 : i32
    %c0_i32_1 = arith.constant 0 : i32
    return %c0_i32, %c0_i32_0 : i32, i32
  }
  func.func @transform_3(%arg0: i32, %arg1: memref<6xi32, #tpu.memory_space<smem>>) -> (i32, i32) {
    %c0_i32 = arith.constant 0 : i32
    %c0_i32_0 = arith.constant 0 : i32
    %c0_i32_1 = arith.constant 0 : i32
    return %c0_i32, %c0_i32_0 : i32, i32
  }
  func.func @transform_4(%arg0: i32, %arg1: memref<6xi32, #tpu.memory_space<smem>>) -> (i32, i32) {
    %c0_i32 = arith.constant 0 : i32
    %c0_i32_0 = arith.constant 0 : i32
    %c0_i32_1 = arith.constant 0 : i32
    return %c0_i32, %c0_i32_0 : i32, i32
  }
  func.func @transform_5(%arg0: i32, %arg1: memref<6xi32, #tpu.memory_space<smem>>) -> (i32, i32) {
    %c0_i32 = arith.constant 0 : i32
    %c0_i32_0 = arith.constant 0 : i32
    %c0_i32_1 = arith.constant 0 : i32
    return %c0_i32, %c0_i32_0 : i32, i32
  }
  func.func @transform_6(%arg0: i32, %arg1: memref<6xi32, #tpu.memory_space<smem>>) -> (i32, i32) {
    %c0_i32 = arith.constant 0 : i32
    %c0_i32_0 = arith.constant 0 : i32
    %c0_i32_1 = arith.constant 0 : i32
    return %c0_i32, %c0_i32_0 : i32, i32
  }
  func.func @transform_7(%arg0: i32, %arg1: memref<6xi32, #tpu.memory_space<smem>>) -> (i32, i32) {
    %c0_i32 = arith.constant 0 : i32
    %c0_i32_0 = arith.constant 0 : i32
    %c0_i32_1 = arith.constant 0 : i32
    return %c0_i32, %c0_i32_0 : i32, i32
  }
  func.func @transform_8(%arg0: i32, %arg1: memref<6xi32, #tpu.memory_space<smem>>) -> (i32, i32) {
    %c0_i32 = arith.constant 0 : i32
    %c0_i32_0 = arith.constant 0 : i32
    %c0_i32_1 = arith.constant 0 : i32
    return %c0_i32, %c0_i32_0 : i32, i32
  }
  func.func @transform_9(%arg0: i32, %arg1: memref<6xi32, #tpu.memory_space<smem>>) -> (i32, i32) {
    %c0_i32 = arith.constant 0 : i32
    %c0_i32_0 = arith.constant 0 : i32
    %c0_i32_1 = arith.constant 0 : i32
    return %c0_i32, %c0_i32_0 : i32, i32
  }
  func.func @transform_10(%arg0: i32, %arg1: memref<6xi32, #tpu.memory_space<smem>>) -> (i32, i32) {
    %c0_i32 = arith.constant 0 : i32
    %c0_i32_0 = arith.constant 0 : i32
    %c0_i32_1 = arith.constant 0 : i32
    return %c0_i32, %c0_i32_0 : i32, i32
  }
  func.func @transform_11(%arg0: i32, %arg1: memref<6xi32, #tpu.memory_space<smem>>) -> (i32, i32) {
    %c0_i32 = arith.constant 0 : i32
    %c0_i32_0 = arith.constant 0 : i32
    %c0_i32_1 = arith.constant 0 : i32
    return %c0_i32, %c0_i32_0 : i32, i32
  }
  func.func @transform_12(%arg0: i32, %arg1: memref<6xi32, #tpu.memory_space<smem>>) -> (i32, i32) {
    %c0_i32 = arith.constant 0 : i32
    %c0_i32_0 = arith.constant 0 : i32
    %c0_i32_1 = arith.constant 0 : i32
    return %c0_i32, %c0_i32_0 : i32, i32
  }
}

</mosaic_0001>

<bundles_post_ra>
// kernel: tpu_custom_call.1
= control target key start
LH: loop header
LB: loop body
LE: loop exit
PB: predicated region body
PF: predicated region fallthrough
CT: control target
= control target key end

     0   :  { %s623_s28 = smov [#allocation3]   ;;  %s1008_s0 = inlined_call_operand.vmem [shape: s32[6], index: 0, kind: input, shape index: {}]   ;;  %s1009_s1 = inlined_call_operand.vmem [shape: f32[64,32], index: 1, kind: input, shape index: {}]   ;;  %s1010_s2 = inlined_call_operand.vmem [shape: f32[1,32], index: 2, kind: input, shape index: {}]   ;;  %s1011_s3 = inlined_call_operand.vmem [shape: f32[1,32], index: 3, kind: input, shape index: {}]   ;;  %s1012_s4 = inlined_call_operand.vmem [shape: f32[64,128], index: 4, kind: input, shape index: {}]   ;;  %s1013_s5 = inlined_call_operand.vmem [shape: f32[1,128], index: 5, kind: input, shape index: {}]   ;;  %s1014_s6 = inlined_call_operand.vmem [shape: f32[128,32], index: 6, kind: input, shape index: {}]   ;;  %s1015_s7 = inlined_call_operand.vmem [shape: f32[1,128], index: 7, kind: input, shape index: {}]   ;;  %s1016_s8 = inlined_call_operand.vmem [shape: f32[64,128], index: 8, kind: input, shape index: {}]   ;;  %s1017_s9 = inlined_call_operand.vmem [shape: f32[1,128], index: 9, kind: input, shape index: {}]   ;;  %s1018_s10 = inlined_call_operand.hbm [shape: f32[6,128], index: 10, kind: output, shape index: {0}]   ;;  %s1019_s11 = inlined_call_operand.hbm [shape: f32[6,128], index: 11, kind: output, shape index: {1}]   ;;  %s1020_s12 = inlined_call_operand.hbm [shape: f32[1,32], index: 12, kind: output, shape index: {2}]   ;;  %s1021_s13 = inlined_call_operand.hbm [shape: f32[1,32], index: 13, kind: output, shape index: {3}]  }
   0x1   :  { %s20_s27 = sshll.u32 %s1008_s0, 4  ;;  %s21_s27 = int_to_ptr.vmem [resolvable:$true] %s20_s27 }
   0x2   :  { %23 = dma.vmem_to_smem %s21_s27, 16, %s623_s28, [#allocation2] }
   0x3   :  { %603 = dma.done.wait [#allocation2], 16 }
   0x4   :  { %604 = vsyncadd [#allocation2], 4294967280 }
   0x5   :  { %26 = sfence }
   0x6   :  { %27 = vsyncpa [#allocation5], 0 }
   0x7   :  { %28 = vsyncpa [#allocation7], 0 }
   0x8   :  { %29 = vsyncpa [#allocation10], 0  ;;  %v707_v0 = vld [vmem:[%s1012_s4] sm:$0xff]  ;;  %v712_v1 = vld [vmem:[%s1012_s4 + $0x8] sm:$0xff]  ;;  %s889_s23 = smov 0  }
   0x9   :  { %v717_v2 = vld [vmem:[%s1012_s4 + $0x10] sm:$0xff]  ;;  %v722_v3 = vld [vmem:[%s1012_s4 + $0x18] sm:$0xff]  ;;  %v727_v4 = vld [vmem:[%s1012_s4 + $0x20] sm:$0xff] }
   0xa   :  { %v732_v5 = vld [vmem:[%s1012_s4 + $0x28] sm:$0xff]  ;;  %v737_v6 = vld [vmem:[%s1012_s4 + $0x30] sm:$0xff]  ;;  %v742_v7 = vld [vmem:[%s1012_s4 + $0x38] sm:$0xff] }
   0xb   :  { %v747_v8 = vld [vmem:[%s1013_s5] sm:$0x1]  ;;  %v757_v10 = vld [vmem:[%s1014_s6 + $0x8] sm:$0xff]  ;;  %v762_v11 = vld [vmem:[%s1014_s6 + $0x10] sm:$0xff] }
   0xc   :  { %v752_v9 = vld [vmem:[%s1014_s6] sm:$0xff]  ;;  %v767_v12 = vld [vmem:[%s1014_s6 + $0x18] sm:$0xff]  ;;  %v777_v14 = vld [vmem:[%s1014_s6 + $0x28] sm:$0xff] }
   0xd   :  { %v772_v13 = vld [vmem:[%s1014_s6 + $0x20] sm:$0xff]  ;;  %v782_v15 = vld [vmem:[%s1014_s6 + $0x30] sm:$0xff]  ;;  %v787_v16 = vld [vmem:[%s1014_s6 + $0x38] sm:$0xff] }
   0xe   :  { %v792_v17 = vld [vmem:[%s1014_s6 + $0x40] sm:$0xff]  ;;  %v797_v18 = vld [vmem:[%s1014_s6 + $0x48] sm:$0xff]  ;;  %v802_v19 = vld [vmem:[%s1014_s6 + $0x50] sm:$0xff] }
   0xf   :  { %v807_v20 = vld [vmem:[%s1014_s6 + $0x58] sm:$0xff]  ;;  %v812_v21 = vld [vmem:[%s1014_s6 + $0x60] sm:$0xff]  ;;  %v817_v22 = vld [vmem:[%s1014_s6 + $0x68] sm:$0xff] }
  0x10   :  { %v822_v23 = vld [vmem:[%s1014_s6 + $0x70] sm:$0xff]  ;;  %v827_v24 = vld [vmem:[%s1014_s6 + $0x78] sm:$0xff]  ;;  %v832_v25 = vld [vmem:[%s1015_s7] sm:$0x1] }
  0x11   :  { %v837_v26 = vld [vmem:[%s1016_s8] sm:$0xff]  ;;  %v842_v27 = vld [vmem:[%s1016_s8 + $0x8] sm:$0xff]  ;;  %v847_v28 = vld [vmem:[%s1016_s8 + $0x10] sm:$0xff] }
  0x12   :  { %v852_v29 = vld [vmem:[%s1016_s8 + $0x18] sm:$0xff]  ;;  %v857_v30 = vld [vmem:[%s1016_s8 + $0x20] sm:$0xff]  ;;  %v862_v31 = vld [vmem:[%s1016_s8 + $0x28] sm:$0xff] }
  0x13   :  { %v867_v32 = vld [vmem:[%s1016_s8 + $0x30] sm:$0xff]  ;;  %v872_v33 = vld [vmem:[%s1016_s8 + $0x38] sm:$0xff]  ;;  %v877_v34 = vld [vmem:[%s1017_s9] sm:$0x1] }
  0x14   :  { %v83_v35 = vld [vmem:[%s1010_s2] sm:$0x1]  }
  0x15   :  { %v84_v36 = vld [vmem:[%s1011_s3] sm:$0x1]  }
  0x16 LB: > { %115 = vmatpush.msra.mxu0 %v742_v7  ;;  %266 = vmatpush.msra.mxu2 %v827_v24  ;;  %s624_s2 = smov 32   ;;  %vm101_vm0 = vcmask 261120   ;;  %s93_s3 = sld [smem:[#allocation3 + %s621_s23]]  ;;  %vm103_vm1 = vcmask 523264   ;;  %vm241_vm6 = vcmask 1040384   ;;  %s621_s23 = sphi %s889_s23, %s90_s23   ;;  %v617_v35 = vphi %v83_v35, %v1024_v35   ;;  %v613_v36 = vphi %v84_v36, %v1023_v36  }
  0x17   : > { %303 = vmatpush.msra.mxu3 %v872_v33  ;;  %98 = vrot.lane.b32.xlu0 %v617_v35, %s624_s2  ;;  %s625_s25 = smov 64   ;;  %s626_s26 = smov 96  }
  0x18   : > { %116 = vmatpush.msra.mxu0 %v737_v6  ;;  %267 = vmatpush.msra.mxu2 %v822_v23  ;;  %s329_s27 = scalar_lea.vmem [#allocation6], %s621_s23  ;;  %s327_s28 = scalar_lea.vmem [#allocation4], %s621_s23 }
  0x19   : > { %304 = vmatpush.msra.mxu3 %v867_v32  ;;  %417 = vmatpush.xpose.msk.msra.mxu1 %vm101_vm0, %v827_v24  ;;  %s90_s23 = sadd.s32 1, %s621_s23  }
  0x1a   : > { %117 = vmatpush.msra.mxu0 %v732_v5  ;;  %268 = vmatpush.msra.mxu2 %v817_v22  ;;  %p87_p0 = scmp.ge.s32.totalorder %s90_s23, 6  }
  0x1b   : > { %305 = vmatpush.msra.mxu3 %v862_v31  ;;  %148 = vrot.lane.b32.xlu1 %v613_v36, %s624_s2  ;;  %vm335_vm11 = vcmask (%p87_p0), 253952   ;;  %s356_s7 = sshll.u32 (%p87_p0), %s1019_s11, 4  ;;  %s627_s30 = smov (%p87_p0), [#allocation6]   ;;  %s357_s7 = int_to_ptr.hbm [resolvable:$true] %s356_s7 }
  0x1c   : > { %118 = vmatpush.msra.mxu0 %v727_v4  ;;  %269 = vmatpush.msra.mxu2 %v812_v21  ;;  %s94_s24 = scalar_lea.vmem %s1009_s1, %s93_s3  ;;  %s354_s14 = sshll.u32 (%p87_p0), %s627_s30, 4  ;;  %s355_s14 = int_to_ptr.vmem [resolvable:$true] %s354_s14 }
  0x1d   : > { %306 = vmatpush.msra.mxu3 %v857_v30  ;;  %418 = vmatpush.xpose.msk.msra.mxu1 %vm101_vm0, %v822_v23  ;;  %v95_v37 = vld [vmem:[%s94_s24] sm:$0x1]  ;;  %s628_s15 = smov (%p87_p0), [#allocation4]   ;;  %s345_s17 = sshll.u32 (%p87_p0), %s1018_s10, 4  ;;  %s346_s17 = int_to_ptr.hbm [resolvable:$true] %s345_s17 }
  0x1e   : > { %119 = vmatpush.msra.mxu0 %v722_v3  ;;  %270 = vmatpush.msra.mxu2 %v807_v20  ;;  %v96_v38 = vmax.f32 %v95_v37, 0.0  ;;  %s343_s0 = sshll.u32 (%p87_p0), %s628_s15, 4  ;;  %s367_s11 = sshll.u32 (%p87_p0), %s1020_s12, 4  ;;  %s344_s0 = int_to_ptr.vmem [resolvable:$true] %s343_s0  ;;  %s368_s11 = int_to_ptr.hbm [resolvable:$true] %s367_s11 }
  0x1f   : > { %307 = vmatpush.msra.mxu3 %v852_v29  ;;  %s629_s18 = smov (%p87_p0), [#allocation8]   ;;  %s630_s20 = smov (%p87_p0), [#allocation9]  }
  0x20   : > { %120 = vmatpush.msra.mxu0 %v717_v2  ;;  %271 = vmatpush.msra.mxu2 %v802_v19  ;;  %s365_s19 = sshll.u32 (%p87_p0), %s629_s18, 4  ;;  %s376_s21 = sshll.u32 (%p87_p0), %s630_s20, 4  ;;  %s366_s19 = int_to_ptr.vmem [resolvable:$true] %s365_s19  ;;  %s377_s21 = int_to_ptr.vmem [resolvable:$true] %s376_s21 }
  0x21   : > { %308 = vmatpush.msra.mxu3 %v847_v28  ;;  %419 = vmatpush.xpose.msk.msra.mxu1 %vm101_vm0, %v817_v22 }
  0x22   : > { %121 = vmatpush.msra.mxu0 %v712_v1  ;;  %272 = vmatpush.msra.mxu2 %v797_v18 }
  0x23   : > { %309 = vmatpush.msra.mxu3 %v842_v27 }
  0x24   : > { %122 = vmatpush.msra.mxu0 %v707_v0  ;;  %273 = vmatpush.msra.mxu2 %v792_v17 }
  0x25   : > { %310 = vmatpush.msra.mxu3 %v837_v26  ;;  %420 = vmatpush.xpose.msk.msra.mxu1 %vm101_vm0, %v812_v21 }
  0x26   : > { %274 = vmatpush.msra.mxu2 %v787_v16 }
  0x28   : > { %275 = vmatpush.msra.mxu2 %v782_v15 }
  0x29   : > { %421 = vmatpush.xpose.msk.msra.mxu1 %vm101_vm0, %v807_v20 }
  0x2a   : > { %276 = vmatpush.msra.mxu2 %v777_v14 }
  0x2c   : > { %277 = vmatpush.msra.mxu2 %v772_v13 }
  0x2d   : > { %422 = vmatpush.xpose.msk.msra.mxu1 %vm101_vm0, %v802_v19 }
  0x2e   : > { %278 = vmatpush.msra.mxu2 %v767_v12 }
  0x30   : > { %279 = vmatpush.msra.mxu2 %v762_v11 }
  0x31   : > { %423 = vmatpush.xpose.msk.msra.mxu1 %vm101_vm0, %v797_v18 }
  0x32   : > { %280 = vmatpush.msra.mxu2 %v757_v10 }
  0x34   : > { %281 = vmatpush.msra.mxu2 %v752_v9 }
  0x35   : > { %424 = vmatpush.xpose.msk.msra.mxu1 %vm101_vm0, %v792_v17 }
  0x39   : > { %425 = vmatpush.xpose.msk.msra.mxu1 %vm101_vm0, %v787_v16 }
  0x3d   : > { %426 = vmatpush.xpose.msk.msra.mxu1 %vm101_vm0, %v782_v15 }
  0x41   : > { %427 = vmatpush.xpose.msk.msra.mxu1 %vm101_vm0, %v777_v14 }
  0x45   : > { %428 = vmatpush.xpose.msk.msra.mxu1 %vm101_vm0, %v772_v13 }
  0x49   : > { %429 = vmatpush.xpose.msk.msra.mxu1 %vm101_vm0, %v767_v12 }
  0x4d   : > { %430 = vmatpush.xpose.msk.msra.mxu1 %vm101_vm0, %v762_v11 }
  0x51   : > { %431 = vmatpush.xpose.msk.msra.mxu1 %vm101_vm0, %v757_v10 }
  0x55   : > { %432 = vmatpush.xpose.msk.msra.mxu1 %vm101_vm0, %v752_v9 }
  0x89   : > { %v99_v39 = vpop.permute.xlu0 %98 }
  0x8a   : > { %v102_v40 = vsel %vm101_vm0, %v96_v38, %v99_v39 }
  0x8b   : > { %415 = vmatmul.msk.f32.vlgmr.msra.gmra.mxu0 %vm103_vm1, %v102_v40 }
  0x8d   : > { %v149_v59 = vpop.permute.xlu1 %148 }
 0x108   : > { %v124_v41 = vpop.f32.mrf.mxu0 }
 0x109   : > { %v125_v42 = vadd.f32 %v124_v41, %v747_v8 }
 0x10b   : > { %467 = vtanh.f32 %v125_v42  ;;  %v416_v44 = vmul.f32 -1.442695, %v125_v42 }
 0x10d   : > { %469 = vpow2.f32 %v416_v44 }
 0x111   : > { %v468_v43 = vpop.eup %467 }
 0x112   : > { %153 = vrot.lane.b32.xlu0 %v468_v43, %s625_s25 }
 0x113   : > { %v470_v45 = vpop.eup %469 }
 0x114   : > { %v130_v46 = vadd.f32 1.0, %v470_v45 }
 0x116   : > { %471 = vrcp.f32 %v130_v46  ;;  %v142_v52 = vand.u32 2147483648, %v130_v46  ;;  %vm136_vm3 = vweird.f32 %v130_v46  ;;  %v140_v53 = vand.u32 2147483647, %v130_v46 }
 0x118   : > { %v143_v55 = vor.u32 1.1754944e-38, %v142_v52  ;;  %vm141_vm5 = vcmp.eq.f32.partialorder %v140_v53, 8.507059e+37 }
 0x11c   : > { %v472_v47 = vpop.eup %471 }
 0x11d   : > { %v132_v48 = vmul.f32 %v472_v47, %v130_v46  ;;  %vm137_vm2 = vweird.f32 %v472_v47 }
 0x11e   : > { %vm138_vm4 = vmor %vm136_vm3, %vm137_vm2 }
 0x11f   : > { %v133_v49 = vsub.f32 1.0, %v132_v48 }
 0x121   : > { %v134_v50 = vmul.f32 %v472_v47, %v133_v49 }
 0x123   : > { %v135_v51 = vadd.f32 %v472_v47, %v134_v50 }
 0x125   : > { %v139_v54 = vsel %vm138_vm4, %v472_v47, %v135_v51 }
 0x126   : > { %v144_v56 = vsel %vm141_vm5, %v143_v55, %v139_v54 }
 0x127   : > { %v151_v60 = vmul.f32 %v149_v59, %v144_v56 }
 0x184   : > { %v154_v57 = vpop.permute.xlu0 %153 }
 0x185   : > { %v156_v58 = vmul.f32 %v154_v57, %v144_v56 }
 0x187   : > { %158 = vrot.lane.b32.xlu1 %v156_v58, %s624_s2 }
 0x1f9   : > { %v159_v61 = vpop.permute.xlu1 %158 }
 0x1fa   : > { %v161_v62 = vadd.f32 %v159_v61, %v151_v60 }
 0x1fc   : > { %473 = vtanh.f32 %v161_v62 }
 0x202   : > { %v474_v63 = vpop.eup %473 }
 0x203   : > { %164 = vrot.lane.b32.xlu2 %v474_v63, %s625_s25 }
 0x25d   : > { %v165_v35 = vpop.permute.xlu2 %164 }
 0x25e   : > { %v167_v36 = vmul.f32 %v165_v35, %v144_v56 }
 0x260   : > { %169 = vrot.lane.b32.xlu2 %v167_v36, %s624_s2 }
 0x2ba   : > { %v971_v35 = vpop.permute.xlu2 %169  }
 0x2bb   : > { %v1022_v37 = vmov %v971_v35 }
 0x2bc   : > { %433 = vmatmul.msk.f32.vlgmr.msra.gmra.mxu1 %vm101_vm0, %v1022_v37  ;;  %336 = vst.msk [vmem:[#allocation8] sm:$0x1] (%p87_p0), %vm335_vm11, %v1022_v37 }
 0x339   : > { %v238_v38 = vpop.f32.mrf.mxu1 }
 0x33a   : > { %v239_v39 = vadd.f32 %v238_v38, %v832_v25 }
 0x33c   : > { %v242_v40 = vsel %vm241_vm6, %v239_v39, -inf }
 0x33d   : > { %243 = vmax.xlane.f32.xlu0 %v242_v40 }
 0x3b0   : > { %v244_v41 = vpop.xlane.xlu0 %243 }
 0x3b1   : > { %v245_v42 = vsub.f32 %v239_v39, %v244_v41 }
 0x3b3   : > { %v246_v43 = vmul.f32 1.442695, %v245_v42 }
 0x3b5   : > { %475 = vpow2.f32 %v246_v43 }
 0x3bb   : > { %v476_v44 = vpop.eup %475 }
 0x3bc   : > { %v248_v45 = vsel %vm241_vm6, %v476_v44, 0.0 }
 0x3bd   : > { %249 = vadd.xlane.f32.xlu1 %v248_v45 }
 0x3d6   : > { %332 = vrot.lane.b32.xlu1 %v161_v62, %s626_s26 }
 0x430   : > { %v250_v46 = vpop.xlane.xlu1 %249 }
 0x431   : > { %477 = vrcp.f32 %v250_v46  ;;  %v262_v50 = vand.u32 2147483648, %v250_v46  ;;  %v260_v52 = vand.u32 2147483647, %v250_v46  ;;  %vm256_vm8 = vweird.f32 %v250_v46 }
 0x433   : > { %v263_v54 = vor.u32 1.1754944e-38, %v262_v50  ;;  %vm261_vm10 = vcmp.eq.f32.partialorder %v260_v52, 8.507059e+37 }
 0x437   : > { %v478_v47 = vpop.eup %477 }
 0x438   : > { %v252_v48 = vmul.f32 %v478_v47, %v250_v46  ;;  %vm257_vm7 = vweird.f32 %v478_v47 }
 0x439   : > { %vm258_vm9 = vmor %vm256_vm8, %vm257_vm7 }
 0x43a   : > { %v253_v49 = vsub.f32 1.0, %v252_v48 }
 0x43c   : > { %v254_v51 = vmul.f32 %v478_v47, %v253_v49 }
 0x43e   : > { %v255_v53 = vadd.f32 %v478_v47, %v254_v51 }
 0x440   : > { %v259_v55 = vsel %vm258_vm9, %v478_v47, %v255_v53 }
 0x441   : > { %v264_v56 = vsel %vm261_vm10, %v263_v54, %v259_v55 }
 0x442   : > { %v265_v57 = vmul.f32 %v476_v44, %v264_v56 }
 0x444   : > { %282 = vmatmul.f32.vlgmr.msra.gmra.mxu2 %v265_v57  ;;  %330 = vst [vmem:[%s329_s27] sm:$0x1] %v265_v57 }
 0x445   :  { %359 = dma.vmem_to_hbm [thread:$0]  (%p87_p0), %s355_s14, 128, %s357_s7, [#allocation7]  }
 0x446   :  { %370 = dma.vmem_to_hbm [thread:$0]  (%p87_p0), %s366_s19, 16, %s368_s11, [#allocation7]  }
 0x448   : > { %v333_v58 = vpop.permute.xlu1 %332  }
 0x449   :  { %337 = vst.msk [vmem:[#allocation9] sm:$0x1] (%p87_p0), %vm335_vm11, %v333_v58 }
 0x4c7   : > { %v283_v59 = vpop.f32.mrf.mxu2 }
 0x4c8   : > { %288 = vrot.lane.b32.xlu2 %v283_v59, %s624_s2  ;;  %s378_s2 = sshll.u32 (%p87_p0), %s1021_s13, 4  ;;  %s379_s2 = int_to_ptr.hbm [resolvable:$true] %s378_s2 }
 0x4c9   :  { %381 = dma.vmem_to_hbm [thread:$0]  (%p87_p0), %s377_s21, 16, %s379_s2, [#allocation10]  }
 0x522   : > { %v289_v60 = vpop.permute.xlu2 %288 }
 0x523   : > { %v291_v61 = vsel %vm101_vm0, %v1022_v37, %v289_v60 }
 0x524   : > { %434 = vmatmul.msk.f32.vlgmr.msra.gmra.mxu3 %vm103_vm1, %v291_v61 }
 0x5a7   : > { %v312_v62 = vpop.f32.mrf.mxu3 }
 0x5a8   : > { %v313_v63 = vadd.f32 %v312_v62, %v877_v34 }
 0x5aa   : > { %v315_v35 = vsel %vm241_vm6, %v313_v63, -inf }
 0x5ab   : > { %316 = vmax.xlane.f32.xlu2 %v315_v35  ;;  %v1024_v35 = vmov %v1022_v37 }
 0x61e   : > { %v317_v36 = vpop.xlane.xlu2 %316 }
 0x61f   : > { %v318_v38 = vsub.f32 %v313_v63, %v317_v36  ;;  %v1023_v36 = vmov %v333_v58 }
 0x621   : > { %v319_v39 = vmul.f32 1.442695, %v318_v38 }
 0x623   : > { %479 = vpow2.f32 %v319_v39 }
 0x629   : > { %v480_v40 = vpop.eup %479 }
 0x62a   : > { %v321_v41 = vsel %vm241_vm6, %v480_v40, 0.0 }
 0x62b   : > { %322 = vadd.xlane.f32.xlu0 %v321_v41 }
 0x69e   : > { %v323_v42 = vpop.xlane.xlu0 %322 }
 0x69f   : > { %481 = vlog2.f32 %v323_v42 }
 0x6a5   : > { %v482_v43 = vpop.eup %481 }
 0x6a6   : > { %v325_v44 = vmul.f32 0.6931472, %v482_v43  ;;  %89 = sbr.rel (!%p87_p0) target bundleno = 22 (0x16), region = 90 }
 0x6a8   : > { %v326_v45 = vsub.f32 %v318_v38, %v325_v44 }
 0x6aa   : > { %328 = vst [vmem:[%s327_s28] sm:$0x1] %v326_v45 }
 0x6ab   :  { %348 = dma.vmem_to_hbm [thread:$0]  %s344_s0, 128, %s346_s17, [#allocation5]  }
 0x6ac   :  { %605 = dma.done.wait [#allocation5], 128  }
 0x6ad   :  { %606 = vsyncadd [#allocation5], 4294967168 }
 0x6ae   :  { %607 = dma.done.wait [#allocation7], 144  }
 0x6af   :  { %608 = vsyncadd [#allocation7], 4294967152 }
 0x6b0   :  { %609 = dma.done.wait [#allocation10], 16  }
 0x6b1   :  { %610 = vsyncadd [#allocation10], 4294967280 }
 0x6b2   :  { %398 = vsyncpa [#allocation5], 1 }
 0x6b3   :  { %399 = vsyncpa [#allocation7], 1 }
 0x6b4   :  { %400 = vsyncpa [#allocation10], 1 }

</bundles_post_ra>
